<compile_context>
chip_gen: v7x
topology: tpu7x:2x2x1
jax: 0.10.0
libtpu: 0.0.40
codegen_flags: <defaults>
</compile_context>

<pallas_src>
import jax
import jax.numpy as jnp
from jax import lax
from jax.experimental import pallas as pl
from jax.experimental.pallas import tpu as pltpu


def _round_up(x, m):
    return ((x + m - 1) // m) * m


def _classifier_kernel(x_ref, w1_ref, b1_ref, w2_ref, b2_ref, o_ref):
    """One batch tile of the 2-layer MLP head, computed in (H, TB) orientation.

    x_ref : (C, TB, F)  f32/bf16  activation tile (original torch layout, no transpose)
    w1_ref: (C, Hp, F)  bf16      W1.reshape(H, C, F) -> (C, Hp, F), H zero-padded to 8k
    b1_ref: (Hp, 1)     f32
    w2_ref: (Hp, 1)     f32       layer-2 weight column (zero-padded)
    b2_ref: (1, 1)      f32       scalar bias in SMEM
    o_ref : (1, TB)     f32       lane-dense sigmoid output
    """
    C, TB, F = x_ref.shape
    Hp = w1_ref.shape[1]

    # ---- Layer 1: Linear(C*F -> H), transposed orientation ----------------
    # torch computes transpose(X,0,1).reshape(B, C*F) @ W1^T.  Instead of
    # materializing that transpose in HBM, contract F per component on the MXU
    # (A @ B.T dimension numbers, same as q@k.T in flash attention) and
    # accumulate in f32:   hT[:, b] = sum_c W1_3d[c] @ X[c, b, :]  -> (Hp, TB)
    acc = jnp.zeros((Hp, TB), jnp.float32)
    for c in range(C):                                # C is a small static constant
        x_c = x_ref[c].astype(jnp.bfloat16)           # (TB, F) bf16 into the MXU
        acc = acc + lax.dot_general(
            w1_ref[c], x_c,
            dimension_numbers=(((1,), (1,)), ((), ())),   # contract F on both sides
            preferred_element_type=jnp.float32)           # f32 accumulation
    h = jnp.maximum(acc + b1_ref[...], 0.0)           # bias + ReLU on the VPU (f32)

    # Dropout -> identity (inference / eval-mode semantics)
    # TODO(synk): training-mode Dropout (p=0.5 with 1/(1-p) scaling) would need
    #             pltpu.prng_seed / pltpu.prng_random_bits; omitted for inference.

    # ---- Layer 2: Linear(H -> 1) + Sigmoid --------------------------------
    # In the (Hp, TB) orientation this is a sublane-direction weighted reduce;
    # the (1, TB) result is already lane-dense (full-width stores, no relayout).
    z = jnp.sum(h * w2_ref[...], axis=0, keepdims=True) + b2_ref[0, 0]   # (1, TB)
    o_ref[...] = jax.nn.sigmoid(z)


def _vmem_capacity_bytes():
    try:
        cap = int(pltpu.get_tpu_info().vmem_capacity_bytes)
        return max(32 << 20, min(cap, 128 << 20))
    except Exception:
        return 64 << 20          # conservative (v7x-sized) fallback


def _choose_batch_tile(B, C, x_itemsize, vmem_cap):
    """Pick the batch tile TB and the VMEM limit to request.

    VMEM cost of one X buffer: the (C, TB, F) block lane-pads F -> 128 under
    native (8,128) tiling, so it costs C * TB * 128 * itemsize  (NOT C*TB*F*it).
    """
    per_row = C * 128 * x_itemsize               # lane-padded bytes per batch row
    budget = vmem_cap // 2                       # the X double-buffer gets ~half of VMEM
    tb_cap = (budget // (2 * per_row)) // 128 * 128
    tb_cap = max(128, min(tb_cap, 32768))        # ~8K on v7x, ~16K on v5e/v6e (f32 X)
    if B <= 1024:
        tb = B                                   # single block (block dims == array dims)
    else:
        # >= 2 steps so both v7x TensorCores get a "parallel" tile; 128-aligned
        # tiles keep boundary blocks on the (8,128)-friendly path.
        tb = min(tb_cap, _round_up(pl.cdiv(B, 2), 128))
    x_window = 2 * C * tb * 128 * x_itemsize     # double-buffered, lane-padded
    vmem_limit = min(vmem_cap - (4 << 20), max(32 << 20, x_window + (16 << 20)))
    return tb, int(vmem_limit)


def classifier_forward(X, params):
    """X: (n_components, B, n_filters) f32 or bf16 -> (B,) float32 probabilities.

    params use torch layout: w1 (H, C*F), b1 (H,), w2 (1, H), b2 (1,).
    bf16 X is accepted end-to-end (no wrapper-side cast; the kernel's bf16 cast
    before the MXU is then a no-op).
    """
    w1, b1, w2, b2 = params
    C, B, F = X.shape
    H, D = w1.shape
    assert D == C * F, (D, C, F)

    # --- kernel-side parameter layout (tiny arrays, fused under jit) -------
    Hp = _round_up(H, 8)                          # sublane-pad hidden width
    w1k = jnp.transpose(w1.reshape(H, C, F), (1, 0, 2))            # (C, H, F)
    w1k = jnp.pad(w1k, ((0, 0), (0, Hp - H), (0, 0))).astype(jnp.bfloat16)
    b1k = jnp.pad(b1.astype(jnp.float32), (0, Hp - H)).reshape(Hp, 1)
    w2k = jnp.pad(w2.reshape(H).astype(jnp.float32), (0, Hp - H)).reshape(Hp, 1)
    b2k = b2.reshape(1, 1).astype(jnp.float32)

    # --- batch tiling (no HBM-side pad or astype of X) ----------------------
    TB, vmem_limit = _choose_batch_tile(B, C, X.dtype.itemsize, _vmem_capacity_bytes())
    grid = (pl.cdiv(B, TB),)
    # Ragged last block: out-of-bounds input rows hold unspecified data, but every
    # output column depends only on its own batch row (no cross-row reductions in
    # the kernel) and OOB output columns are masked on store.

    out = pl.pallas_call(
        _classifier_kernel,
        out_shape=jax.ShapeDtypeStruct((1, B), jnp.float32),
        grid=grid,
        in_specs=[
            pl.BlockSpec((C, TB, F), lambda i: (0, i, 0)),       # batch-tiled X
            pl.BlockSpec((C, Hp, F), lambda i: (0, 0, 0)),       # resident L1 weights
            pl.BlockSpec((Hp, 1), lambda i: (0, 0)),             # resident L1 bias col
            pl.BlockSpec((Hp, 1), lambda i: (0, 0)),             # resident L2 weight col
            pl.BlockSpec(memory_space=pltpu.MemorySpace.SMEM),   # scalar bias b2
        ],
        out_specs=pl.BlockSpec((1, TB), lambda i: (0, i)),
        compiler_params=pltpu.CompilerParams(
            dimension_semantics=("parallel",),   # shard batch tiles across TCs (v7x)
            vmem_limit_bytes=vmem_limit,         # explicit, lane-pad-aware budget
        ),
    )(X, w1k, b1k, w2k, b2k)

    return out[0]      # squeeze -> (B,)


def init_params(key, n_components, n_filters):
    """nn.Linear-style U(-1/sqrt(fan_in), 1/sqrt(fan_in)) init, torch weight layout."""
    D = n_filters * n_components
    H = n_filters
    k1, k2, k3, k4 = jax.random.split(key, 4)
    lim1 = 1.0 / jnp.sqrt(jnp.float32(D))
    lim2 = 1.0 / jnp.sqrt(jnp.float32(H))
    w1 = jax.random.uniform(k1, (H, D), jnp.float32, -lim1, lim1)
    b1 = jax.random.uniform(k2, (H,), jnp.float32, -lim1, lim1)
    w2 = jax.random.uniform(k3, (1, H), jnp.float32, -lim2, lim2)
    b2 = jax.random.uniform(k4, (1,), jnp.float32, -lim2, lim2)
    return w1, b1, w2, b2


def _reference(X, params):
    """Pure-JAX reference with the same bf16-into-MXU numerics as the kernel.

    Note: the kernel feeds bf16 operands to the MXU with f32 accumulation, a
    documented deviation from torch's f32 nn.Linear (error << 1e-3 at D=32/H=8).
    """
    w1, b1, w2, b2 = params
    C, B, F = X.shape
    x2d = jnp.transpose(X, (1, 0, 2)).reshape(B, C * F)
    h = jnp.dot(x2d.astype(jnp.bfloat16), w1.T.astype(jnp.bfloat16),
                preferred_element_type=jnp.float32) + b1[None, :]
    h = jnp.maximum(h, 0.0)
    z = jnp.sum(h * w2[0][None, :], axis=-1) + b2[0]
    return jax.nn.sigmoid(z)


if __name__ == "__main__":
    n_components, n_filters = 4, 8

    key = jax.random.PRNGKey(0)
    kp, kx1, kx2, kx3 = jax.random.split(key, 4)
    params = init_params(kp, n_components, n_filters)
    fwd = jax.jit(classifier_forward)

    # 1) Small batch: single block (block dims == array dims).
    B = 16
    X = jax.random.normal(kx1, (n_components, B, n_filters), jnp.float32)
    out = jax.block_until_ready(fwd(X, params))
    assert out.shape == (B,)
    assert jnp.allclose(out, _reference(X, params), atol=1e-3, rtol=1e-3)

    # 2) Medium, non-128-aligned batch: still a single block, no HBM padding.
    B2 = 600
    X2 = jax.random.normal(kx2, (n_components, B2, n_filters), jnp.float32)
    out2 = jax.block_until_ready(fwd(X2, params))
    assert out2.shape == (B2,)
    assert jnp.allclose(out2, _reference(X2, params), atol=1e-3, rtol=1e-3)

    # 3) B > 1024: multi-step "parallel" grid with a ragged (masked) last block.
    B3 = 2000
    X3 = jax.random.normal(kx3, (n_components, B3, n_filters), jnp.float32)
    out3 = jax.block_until_ready(fwd(X3, params))
    assert out3.shape == (B3,)
    assert jnp.allclose(out3, _reference(X3, params), atol=1e-3, rtol=1e-3)

    # 4) bf16 X passed straight through (no wrapper-side cast, halved HBM traffic).
    X3b = X3.astype(jnp.bfloat16)
    out3b = jax.block_until_ready(fwd(X3b, params))
    assert out3b.shape == (B3,)
    assert jnp.allclose(out3b, _reference(X3b, params), atol=1e-3, rtol=1e-3)

    print("KERNEL_OK")
</pallas_src>

<mosaic_0001>
module attributes {stable_mosaic.version = 11 : i64} {
  func.func @_classifier_kernel(%arg0: i32, %arg1: memref<4x16x8xf32, #tpu.memory_space<vmem>>, %arg2: memref<4x8x8xbf16, #tpu.memory_space<vmem>>, %arg3: memref<8x1xf32, #tpu.memory_space<vmem>>, %arg4: memref<8x1xf32, #tpu.memory_space<vmem>>, %arg5: memref<1x1xf32, #tpu.memory_space<smem>>, %arg6: memref<1x16xf32, #tpu.memory_space<vmem>>) attributes {dimension_semantics = [#tpu.dimension_semantics<parallel>], iteration_bounds = array<i64: 1>, scalar_prefetch = 0 : i64, scratch_operands = 0 : i64, tpu.core_type = #tpu.core_type<tc>, window_params = [{transform_indices = @transform_0, window_bounds = array<i64: 4, 16, 8>}, {pipeline_mode = #tpu.pipeline_mode<synchronous>, transform_indices = @transform_1, window_bounds = array<i64: 4, 8, 8>}, {pipeline_mode = #tpu.pipeline_mode<synchronous>, transform_indices = @transform_2, window_bounds = array<i64: 8, 1>}, {pipeline_mode = #tpu.pipeline_mode<synchronous>, transform_indices = @transform_3, window_bounds = array<i64: 8, 1>}, {transform_indices = @transform_4, window_bounds = array<i64: 1, 1>}, {transform_indices = @transform_5, window_bounds = array<i64: 1, 16>}]} {
    %cst = arith.constant 0.000000e+00 : f32
    %0 = vector.broadcast %cst : f32 to vector<8x16xf32>
    %c0 = arith.constant 0 : index
    %c0_0 = arith.constant 0 : index
    %c0_1 = arith.constant 0 : index
    %1 = vector.load %arg1[%c0, %c0_0, %c0_1] : memref<4x16x8xf32, #tpu.memory_space<vmem>>, vector<1x16x8xf32>
    %2 = vector.shape_cast %1 : vector<1x16x8xf32> to vector<16x8xf32>
    %3 = arith.truncf %2 : vector<16x8xf32> to vector<16x8xbf16>
    %c0_2 = arith.constant 0 : index
    %c0_3 = arith.constant 0 : index
    %c0_4 = arith.constant 0 : index
    %4 = vector.load %arg2[%c0_2, %c0_3, %c0_4] : memref<4x8x8xbf16, #tpu.memory_space<vmem>>, vector<1x8x8xbf16>
    %5 = vector.shape_cast %4 : vector<1x8x8xbf16> to vector<8x8xbf16>
    %cst_5 = arith.constant dense<0.000000e+00> : vector<8x16xf32>
    %6 = tpu.matmul %5, %3, %cst_5 {dimension_numbers = #tpu.dot_dimension_numbers<[1], [1], [0], [0], [0, 0, 1, 0], [], []>} : vector<8x8xbf16>, vector<16x8xbf16>, vector<8x16xf32> -> vector<8x16xf32>
    %7 = arith.addf %0, %6 : vector<8x16xf32>
    %c1 = arith.constant 1 : index
    %c0_6 = arith.constant 0 : index
    %c0_7 = arith.constant 0 : index
    %8 = vector.load %arg1[%c1, %c0_6, %c0_7] : memref<4x16x8xf32, #tpu.memory_space<vmem>>, vector<1x16x8xf32>
    %9 = vector.shape_cast %8 : vector<1x16x8xf32> to vector<16x8xf32>
    %10 = arith.truncf %9 : vector<16x8xf32> to vector<16x8xbf16>
    %c1_8 = arith.constant 1 : index
    %c0_9 = arith.constant 0 : index
    %c0_10 = arith.constant 0 : index
    %11 = vector.load %arg2[%c1_8, %c0_9, %c0_10] : memref<4x8x8xbf16, #tpu.memory_space<vmem>>, vector<1x8x8xbf16>
    %12 = vector.shape_cast %11 : vector<1x8x8xbf16> to vector<8x8xbf16>
    %cst_11 = arith.constant dense<0.000000e+00> : vector<8x16xf32>
    %13 = tpu.matmul %12, %10, %cst_11 {dimension_numbers = #tpu.dot_dimension_numbers<[1], [1], [0], [0], [0, 0, 1, 0], [], []>} : vector<8x8xbf16>, vector<16x8xbf16>, vector<8x16xf32> -> vector<8x16xf32>
    %14 = arith.addf %7, %13 : vector<8x16xf32>
    %c2 = arith.constant 2 : index
    %c0_12 = arith.constant 0 : index
    %c0_13 = arith.constant 0 : index
    %15 = vector.load %arg1[%c2, %c0_12, %c0_13] : memref<4x16x8xf32, #tpu.memory_space<vmem>>, vector<1x16x8xf32>
    %16 = vector.shape_cast %15 : vector<1x16x8xf32> to vector<16x8xf32>
    %17 = arith.truncf %16 : vector<16x8xf32> to vector<16x8xbf16>
    %c2_14 = arith.constant 2 : index
    %c0_15 = arith.constant 0 : index
    %c0_16 = arith.constant 0 : index
    %18 = vector.load %arg2[%c2_14, %c0_15, %c0_16] : memref<4x8x8xbf16, #tpu.memory_space<vmem>>, vector<1x8x8xbf16>
    %19 = vector.shape_cast %18 : vector<1x8x8xbf16> to vector<8x8xbf16>
    %cst_17 = arith.constant dense<0.000000e+00> : vector<8x16xf32>
    %20 = tpu.matmul %19, %17, %cst_17 {dimension_numbers = #tpu.dot_dimension_numbers<[1], [1], [0], [0], [0, 0, 1, 0], [], []>} : vector<8x8xbf16>, vector<16x8xbf16>, vector<8x16xf32> -> vector<8x16xf32>
    %21 = arith.addf %14, %20 : vector<8x16xf32>
    %c3 = arith.constant 3 : index
    %c0_18 = arith.constant 0 : index
    %c0_19 = arith.constant 0 : index
    %22 = vector.load %arg1[%c3, %c0_18, %c0_19] : memref<4x16x8xf32, #tpu.memory_space<vmem>>, vector<1x16x8xf32>
    %23 = vector.shape_cast %22 : vector<1x16x8xf32> to vector<16x8xf32>
    %24 = arith.truncf %23 : vector<16x8xf32> to vector<16x8xbf16>
    %c3_20 = arith.constant 3 : index
    %c0_21 = arith.constant 0 : index
    %c0_22 = arith.constant 0 : index
    %25 = vector.load %arg2[%c3_20, %c0_21, %c0_22] : memref<4x8x8xbf16, #tpu.memory_space<vmem>>, vector<1x8x8xbf16>
    %26 = vector.shape_cast %25 : vector<1x8x8xbf16> to vector<8x8xbf16>
    %cst_23 = arith.constant dense<0.000000e+00> : vector<8x16xf32>
    %27 = tpu.matmul %26, %24, %cst_23 {dimension_numbers = #tpu.dot_dimension_numbers<[1], [1], [0], [0], [0, 0, 1, 0], [], []>} : vector<8x8xbf16>, vector<16x8xbf16>, vector<8x16xf32> -> vector<8x16xf32>
    %28 = arith.addf %21, %27 : vector<8x16xf32>
    %c0_24 = arith.constant 0 : index
    %c0_25 = arith.constant 0 : index
    %29 = vector.load %arg3[%c0_24, %c0_25] : memref<8x1xf32, #tpu.memory_space<vmem>>, vector<8x1xf32>
    %30 = vector.broadcast %29 : vector<8x1xf32> to vector<8x16xf32>
    %31 = arith.addf %28, %30 : vector<8x16xf32>
    %cst_26 = arith.constant 0.000000e+00 : f32
    %32 = vector.broadcast %cst_26 : f32 to vector<8x16xf32>
    %33 = arith.maximumf %31, %32 : vector<8x16xf32>
    %c0_27 = arith.constant 0 : index
    %c0_28 = arith.constant 0 : index
    %34 = vector.load %arg4[%c0_27, %c0_28] : memref<8x1xf32, #tpu.memory_space<vmem>>, vector<8x1xf32>
    %35 = vector.broadcast %34 : vector<8x1xf32> to vector<8x16xf32>
    %36 = arith.mulf %33, %35 : vector<8x16xf32>
    %cst_29 = arith.constant dense<0.000000e+00> : vector<16xf32>
    %37 = vector.multi_reduction <add>, %36, %cst_29 [0] : vector<8x16xf32> to vector<16xf32>
    %38 = vector.shape_cast %37 : vector<16xf32> to vector<1x16xf32>
    %c0_30 = arith.constant 0 : index
    %c0_31 = arith.constant 0 : index
    %39 = memref.load %arg5[%c0_30, %c0_31] : memref<1x1xf32, #tpu.memory_space<smem>>
    %40 = vector.broadcast %39 : f32 to vector<1x16xf32>
    %41 = arith.addf %38, %40 : vector<1x16xf32>
    %42 = arith.negf %41 : vector<1x16xf32>
    %43 = math.exp %42 : vector<1x16xf32>
    %cst_32 = arith.constant 1.000000e+00 : f32
    %44 = vector.broadcast %cst_32 : f32 to vector<1x16xf32>
    %45 = arith.addf %44, %43 : vector<1x16xf32>
    %46 = arith.divf %44, %45 : vector<1x16xf32>
    %c0_33 = arith.constant 0 : index
    %c0_34 = arith.constant 0 : index
    %47 = vector.load %arg6[%c0_33, %c0_34] : memref<1x16xf32, #tpu.memory_space<vmem>>, vector<1x16xf32>
    tpu.vector_store %arg6[%c0_33, %c0_34], %46 {strides = array<i32>} : memref<1x16xf32, #tpu.memory_space<vmem>>, vector<1x16xf32>,
    return
  }
  func.func @transform_0(%arg0: i32) -> (i32, i32, i32) {
    %c0_i32 = arith.constant 0 : i32
    %c0_i32_0 = arith.constant 0 : i32
    %c0_i32_1 = arith.constant 0 : i32
    return %c0_i32, %arg0, %c0_i32_0 : i32, i32, i32
  }
  func.func @transform_1(%arg0: i32) -> (i32, i32, i32) {
    %c0_i32 = arith.constant 0 : i32
    %c0_i32_0 = arith.constant 0 : i32
    %c0_i32_1 = arith.constant 0 : i32
    %c0_i32_2 = arith.constant 0 : i32
    return %c0_i32, %c0_i32_0, %c0_i32_1 : i32, i32, i32
  }
  func.func @transform_2(%arg0: i32) -> (i32, i32) {
    %c0_i32 = arith.constant 0 : i32
    %c0_i32_0 = arith.constant 0 : i32
    %c0_i32_1 = arith.constant 0 : i32
    return %c0_i32, %c0_i32_0 : i32, i32
  }
  func.func @transform_3(%arg0: i32) -> (i32, i32) {
    %c0_i32 = arith.constant 0 : i32
    %c0_i32_0 = arith.constant 0 : i32
    %c0_i32_1 = arith.constant 0 : i32
    return %c0_i32, %c0_i32_0 : i32, i32
  }
  func.func @transform_4(%arg0: i32) -> (i32, i32) {
    %c0_i32 = arith.constant 0 : i32
    %c0_i32_0 = arith.constant 0 : i32
    %c0_i32_1 = arith.constant 0 : i32
    return %c0_i32, %c0_i32_0 : i32, i32
  }
  func.func @transform_5(%arg0: i32) -> (i32, i32) {
    %c0_i32 = arith.constant 0 : i32
    %c0_i32_0 = arith.constant 0 : i32
    return %c0_i32, %arg0 : i32, i32
  }
}

</mosaic_0001>

<bundles_post_ra>
// kernel: classifier_forward.1
= control target key start
LH: loop header
LB: loop body
LE: loop exit
PB: predicated region body
PF: predicated region fallthrough
CT: control target
= control target key end

     0   :  { %vm33_vm0 = vcmask 64512   ;;  %v359_v3 = vmov 0.0   ;;  %vm360_vm1 = vmmov 0   ;;  %v361_v12 = vmov 0   ;;  %s462_s0 = inlined_call_operand.vmem [shape: f32[4,16,8], index: 0, kind: input, shape index: {}]   ;;  %s463_s1 = inlined_call_operand.vmem [shape: bf16[4,8,8], index: 1, kind: input, shape index: {}]   ;;  %s464_s2 = inlined_call_operand.vmem [shape: f32[8,1], index: 2, kind: input, shape index: {}]   ;;  %s465_s3 = inlined_call_operand.vmem [shape: f32[8,1], index: 3, kind: input, shape index: {}]   ;;  %s466_s4 = inlined_call_operand.<no memory space> [shape: f32[1,1], index: 4, kind: input, shape index: {}]   ;;  %s467_s5 = inlined_call_operand.hbm [shape: f32[1,16], index: 5, kind: output, shape index: {}]  }
   0x1   :  { %v280_v0 = vld [vmem:[%s462_s0 + $0x10] sm:$0xff]  ;;  %v281_v1 = vld [vmem:[%s462_s0 + $0x18] sm:$0xff]  ;;  %v23_v2 = vld [vmem:[%s462_s0] sm:$0xff]  ;;  %302 = vmatprep.subr.bf16.mxu0 %v359_v3  ;;  %308 = vmatprep.subr.bf16.mxu1 %v359_v3 }
   0x2   :  { %v30_v4 = vpack.c.bf16 %v281_v1, %v280_v0  ;;  %v24_v5 = vld [vmem:[%s462_s0 + $0x8] sm:$0xff]  ;;  %304 = vmatprep.mubr.msk.bf16.mxu0 %vm360_vm1, %v359_v3  ;;  %310 = vmatprep.mubr.msk.bf16.mxu1 %vm360_vm1, %v359_v3  ;;  %v285_v7 = vld [vmem:[%s462_s0 + $0x20] sm:$0xff]  ;;  %v289_v10 = vld [vmem:[%s462_s0 + $0x30] sm:$0xff] }
   0x3   :  { %v25_v6 = vpack.c.bf16 %v24_v5, %v23_v2  ;;  %v286_v8 = vld [vmem:[%s462_s0 + $0x28] sm:$0xff]  ;;  %v290_v11 = vld [vmem:[%s462_s0 + $0x38] sm:$0xff]  ;;  %330 = vset.pattern.permute.xlu0 %v361_v12  ;;  %v232_v14 = vld [vmem:[%s464_s2] sm:$0xff] }
   0x4   :  { %v38_v9 = vsel %vm33_vm0, %v30_v4, 0 }
   0x5   :  { %303 = vmatpush3.bf16.xpose.msra.mxu0 %v38_v9  ;;  %v84_v13 = vsel %vm33_vm0, %v25_v6, 0 }
   0x6   :  { %11 = vsyncpa [#allocation4], 0  ;;  %309 = vmatpush3.bf16.xpose.msra.mxu1 %v84_v13  ;;  %314 = vmatprep.subr.bf16.mxu0 %v359_v3  ;;  %v129_v15 = vpack.c.bf16 %v286_v8, %v285_v7  ;;  %v182_v16 = vpack.c.bf16 %v290_v11, %v289_v10  ;;  %v240_v17 = vld [vmem:[%s465_s3] sm:$0xff]  ;;  %v287_v22 = vld [vmem:[%s463_s1 + $0x8] sm:$0xf]  ;;  %vm247_vm2 = vcmask 130048   ;;  %v256_v54 = vstv %s466_s4 }
   0x7   :  { %320 = vmatprep.subr.bf16.mxu1 %v359_v3  ;;  %235 = vperm.xlu0 %330, %v232_v14   ;;  %v282_v18 = vld [vmem:[%s463_s1 + $0x4] sm:$0xf]  ;;  %v26_v19 = vld [vmem:[%s463_s1] sm:$0xf]  ;;  %v291_v23 = vld [vmem:[%s463_s1 + $0xc] sm:$0xf] }
   0x8   :  { %v136_v20 = vsel %vm33_vm0, %v129_v15, 0  ;;  %v189_v21 = vsel %vm33_vm0, %v182_v16, 0  ;;  %s362_s19 = smov [#allocation3]   ;;  %vm264_vm3 = vcmask 122880  }
   0x9   :  { %s272_s20 = sshll.u32 %s362_s19, 4  ;;  %s273_s20 = int_to_ptr.vmem [resolvable:$true] %s272_s20 }
   0xa   :  { %s335_s21 = scalar_lea.vmem %s273_s20, 16  ;;  %s339_s22 = scalar_lea.vmem %s273_s20, 32 }
   0xb   :  { %243 = vperm.xlu0 %330, %v240_v17   ;;  %p336_p0 = scmp.ne.s32.totalorder %s273_s20, %s335_s21  ;;  %p340_p1 = scmp.lt.s32.totalorder %s273_s20, %s273_s20 }
   0xc   :  { %305 = vmatmul.mubr.msk.bf16.vlgmr.msra.gmra.mrb[0].mxu0 %vm33_vm0, %v282_v18  ;;  %p341_p2 = scmp.lt.s32.totalorder %s339_s22, %s335_s21 }
   0xd   :  { %311 = vmatmul.mubr.msk.bf16.vlgmr.msra.gmra.mrb[0].mxu1 %vm33_vm0, %v26_v19  ;;  %315 = vmatpush3.bf16.xpose.msra.mxu0 %v136_v20 }
   0xe   :  { %321 = vmatpush3.bf16.xpose.msra.mxu1 %v189_v21  ;;  %316 = vmatprep.mubr.msk.bf16.mxu0 %vm360_vm1, %v359_v3  ;;  %p342_p3 = por %p341_p2, %p340_p1 }
   0xf   :  { %322 = vmatprep.mubr.msk.bf16.mxu1 %vm360_vm1, %v359_v3 }
  0x10   :  { %p343_p4 = pnand %p342_p3, %p336_p0 }
  0x14   :  { %317 = vmatmul.mubr.msk.bf16.vlgmr.msra.gmra.mrb[4].mxu0 %vm33_vm0, %v287_v22 }
  0x15   :  { %323 = vmatmul.mubr.msk.bf16.vlgmr.msra.gmra.mrb[4].mxu1 %vm33_vm0, %v291_v23 }
  0x86   :  { %v236_v34 = vpop.permute.xlu0 %235 }
  0x8a   :  { %v244_v46 = vpop.permute.xlu0 %243 }
  0xdf   :  { %v74_v24 = vpop.f32.mrb[0].mxu0 }
  0xe0   :  { %v120_v25 = vpop.f32.mrb[0].mxu1  ;;  %v306_v26 = vpop.f32.mrb[1].mxu0 }
  0xe1   :  { %v121_v27 = vadd.f32 %v120_v25, %v74_v24  ;;  %v312_v28 = vpop.f32.mrb[1].mxu1  ;;  %v77_v29 = vpop.f32.mrb[2].mxu0 }
  0xe2   :  { %v123_v30 = vpop.f32.mrb[2].mxu1  ;;  %v307_v31 = vpop.f32.mrb[3].mxu0 }
  0xe3   :  { %v313_v32 = vpop.f32.mrb[3].mxu1 }
  0xe7   :  { %v172_v33 = vpop.f32.mrb[4].mxu0 }
  0xe8   :  { %v178_v35 = vadd.f32 %v172_v33, %v121_v27  ;;  %v225_v36 = vpop.f32.mrb[4].mxu1  ;;  %v318_v37 = vpop.f32.mrb[5].mxu0 }
  0xe9   :  { %v324_v38 = vpop.f32.mrb[5].mxu1  ;;  %v175_v39 = vpop.f32.mrb[6].mxu0 }
  0xea   :  { %v231_v40 = vadd.f32 %v225_v36, %v178_v35  ;;  %v228_v41 = vpop.f32.mrb[6].mxu1  ;;  %v319_v42 = vpop.f32.mrb[7].mxu0 }
  0xeb   :  { %v325_v43 = vpop.f32.mrb[7].mxu1 }
  0xec   :  { %v238_v44 = vadd.f32 %v236_v34, %v231_v40 }
  0xee   :  { %v239_v45 = vmax.f32 %v238_v44, 0.0 }
  0xf0   :  { %v246_v47 = vmul.f32 %v244_v46, %v239_v45 }
  0xf2   :  { %v248_v48 = vsel %vm247_vm2, %v246_v47, 0.0 }
  0xf3   :  { %v249_v49 = vrot.slane %v248_v48, 4 }
  0xf5   :  { %v250_v50 = vadd.f32 %v249_v49, %v248_v48 }
  0xf7   :  { %v251_v51 = vrot.slane %v250_v50, 2 }
  0xf9   :  { %v252_v52 = vadd.f32 %v251_v51, %v250_v50 }
  0xfb   :  { %v253_v53 = vrot.slane %v252_v52, 1 }
  0xfd   :  { %v254_v55 = vadd.f32 %v253_v53, %v252_v52 }
  0xff   :  { %v257_v56 = vadd.f32 %v256_v54, %v254_v55 }
 0x101   :  { %v293_v57 = vmul.f32 -1.442695, %v257_v56 }
 0x103   :  { %331 = vpow2.f32 %v293_v57 }
 0x10d   :  { %v332_v58 = vpop.eup %331 }
 0x10e   :  { %v261_v59 = vadd.f32 1.0, %v332_v58 }
 0x110   :  { %333 = vrcp.f32 %v261_v59 }
 0x11a   :  { %v334_v60 = vpop.eup %333 }
 0x11b   :  { %265 = vst.msk [vmem:[#allocation3] sm:$0x1] %vm264_vm3, %v334_v60 }
 0x11c   :  { %346 = shalt.err (!%p343_p4)
}
 0x11d   :  { %s347_s24 = scalar_lea.hbm %s467_s5, 16 }
 0x11e   :  { %p348_p5 = scmp.ne.s32.totalorder %s467_s5, %s347_s24  ;;  %p351_p6 = scmp.lt.u32.totalorder %s347_s24, %s467_s5 }
 0x120   :  { %p353_p7 = pnand %p351_p6, %p348_p5 }
 0x122   :  { %356 = shalt.err (!%p353_p7)
}
 0x123   :  { %275 = dma.vmem_to_hbm [thread:$0]  %s273_s20, 16, %s467_s5, [#allocation4]  }
 0x124   :  { %357 = dma.done.wait [#allocation4], 16  }
 0x125   :  { %358 = vsyncadd [#allocation4], 4294967280 }
 0x126   :  { %279 = vsyncpa [#allocation4], 1 }

</bundles_post_ra>
